<compile_context>
chip_gen: v7x
topology: tpu7x:2x2x1
jax: 0.10.0
libtpu: 0.0.40
codegen_flags: <defaults>
</compile_context>

<pallas_src>
import functools

import jax
import jax.numpy as jnp
from jax.experimental import pallas as pl
from jax.experimental.pallas import tpu as pltpu


def layernorm_kernel(x_ref, g_ref, b_ref, o_ref, *, eps, feature):
    """x_ref/o_ref: (bt, F) with F on lanes; g_ref/b_ref: (1, F) in f32."""
    x = x_ref[...].astype(jnp.float32)
    mean = jnp.mean(x, axis=-1, keepdims=True)          # XLU lane reduction
    xc = x - mean
    # torch.std() default is the unbiased (Bessel, N-1) estimator; guard F==1.
    denom = max(feature - 1, 1)
    var = jnp.sum(xc * xc, axis=-1, keepdims=True) * (1.0 / denom)
    std = jnp.sqrt(var)
    # Per-row reciprocal on the (bt, 1) column instead of a per-element divide
    # over the whole (bt, F) tile; exact (not approx) to keep f32 accuracy.
    inv = 1.0 / (std + eps)                              # eps on std, per spec
    y = xc * inv
    o_ref[...] = (g_ref[...] * y + b_ref[...]).astype(o_ref.dtype)


def _choose_block_rows(rows, feature, itemsize, budget_bytes=2 << 20):
    """Byte-budgeted row tile: multiple of 8, >=2 grid steps when possible."""
    if rows <= 8:
        return rows                          # single block spans the full dim
    bt = max(8, (budget_bytes // (feature * itemsize)) // 8 * 8)
    if rows >= 16:
        # Guarantee at least 2 grid steps so both v7x TensorCores get work;
        # per-step overhead (~0.35 us) is negligible at these sizes.
        half = -(-rows // 2)                 # cdiv(rows, 2)
        half = -(-half // 8) * 8             # round up to multiple of 8
        bt = min(bt, half)
    return min(bt, rows)


def layer_norm(x, gamma, beta, *, eps=1e-6):
    """LayerNorm over the last dim of x (arbitrary leading dims)."""
    orig_shape = x.shape
    F = orig_shape[-1]

    x2 = x.reshape(-1, F)                    # rows on sublanes, F on lanes
    rows = x2.shape[0]

    bt = _choose_block_rows(rows, F, x2.dtype.itemsize)
    grid = (pl.cdiv(rows, bt),)              # masked partial last block: no pad

    g2 = gamma.reshape(1, F).astype(jnp.float32)
    b2 = beta.reshape(1, F).astype(jnp.float32)

    kern = functools.partial(layernorm_kernel, eps=eps, feature=F)

    out = pl.pallas_call(
        kern,
        out_shape=jax.ShapeDtypeStruct((rows, F), x.dtype),
        grid_spec=pltpu.PrefetchScalarGridSpec(
            num_scalar_prefetch=0,
            grid=grid,
            in_specs=[
                pl.BlockSpec((bt, F), lambda i: (i, 0)),   # x rows tile
                pl.BlockSpec((1, F), lambda i: (0, 0)),    # gamma (a_2)
                pl.BlockSpec((1, F), lambda i: (0, 0)),    # beta  (b_2)
            ],
            out_specs=pl.BlockSpec((bt, F), lambda i: (i, 0)),
        ),
        compiler_params=pltpu.CompilerParams(
            dimension_semantics=("parallel",)),
    )(x2, g2, b2)

    return out.reshape(orig_shape)


def layer_norm_ref(x, gamma, beta, eps=1e-6):
    """Pure-JAX reference of the same math (torch-style unbiased std)."""
    xf = x.astype(jnp.float32)
    mean = jnp.mean(xf, axis=-1, keepdims=True)
    var = jnp.sum((xf - mean) ** 2, axis=-1, keepdims=True) / max(
        x.shape[-1] - 1, 1)
    std = jnp.sqrt(var)
    return gamma * (xf - mean) / (std + eps) + beta


if __name__ == "__main__":
    eps = 1e-6
    key = jax.random.PRNGKey(0)
    k1, k2, k3, k4 = jax.random.split(key, 4)

    # LayerNorm(feature=128) applied to x: [batch=2, seq=16, feature=128].
    B, S, F = 2, 16, 128
    x = jax.random.normal(k1, (B, S, F), jnp.float32)
    # Module init is ones/zeros; perturb so scale/shift are actually exercised.
    gamma = 1.0 + 0.1 * jax.random.normal(k2, (F,), jnp.float32)
    beta = 0.1 * jax.random.normal(k3, (F,), jnp.float32)

    out = layer_norm(x, gamma, beta, eps=eps)
    jax.block_until_ready(out)
    ref = layer_norm_ref(x, gamma, beta, eps=eps)
    assert out.shape == x.shape
    assert jnp.allclose(out, ref, atol=1e-5, rtol=1e-5), "mismatch (f32)"

    # Row count not a multiple of the tile -> masked partial last block path.
    x_odd = jax.random.normal(k4, (3, 10, F), jnp.float32)
    out_odd = layer_norm(x_odd, gamma, beta, eps=eps)
    jax.block_until_ready(out_odd)
    ref_odd = layer_norm_ref(x_odd, gamma, beta, eps=eps)
    assert jnp.allclose(out_odd, ref_odd, atol=1e-5, rtol=1e-5), "mismatch (tail)"

    # Native bf16 I/O (half the HBM bytes); compute is still f32 in-kernel.
    xb = x.astype(jnp.bfloat16)
    out_b = layer_norm(xb, gamma, beta, eps=eps)
    jax.block_until_ready(out_b)
    ref_b = layer_norm_ref(xb.astype(jnp.float32), gamma, beta, eps=eps)
    assert out_b.dtype == jnp.bfloat16
    assert jnp.allclose(out_b.astype(jnp.float32), ref_b, atol=5e-2, rtol=5e-2), \
        "mismatch (bf16)"

    print("KERNEL_OK")
</pallas_src>

<mosaic_0001>
module attributes {stable_mosaic.version = 11 : i64} {
  func.func @layernorm_kernel(%arg0: i32, %arg1: memref<16x128xf32, #tpu.memory_space<vmem>>, %arg2: memref<1x128xf32, #tpu.memory_space<vmem>>, %arg3: memref<1x128xf32, #tpu.memory_space<vmem>>, %arg4: memref<16x128xf32, #tpu.memory_space<vmem>>) attributes {dimension_semantics = [#tpu.dimension_semantics<parallel>], iteration_bounds = array<i64: 2>, scalar_prefetch = 0 : i64, scratch_operands = 0 : i64, tpu.core_type = #tpu.core_type<tc>, window_params = [{transform_indices = @transform_0, window_bounds = array<i64: 16, 128>}, {pipeline_mode = #tpu.pipeline_mode<synchronous>, transform_indices = @transform_1, window_bounds = array<i64: 1, 128>}, {pipeline_mode = #tpu.pipeline_mode<synchronous>, transform_indices = @transform_2, window_bounds = array<i64: 1, 128>}, {transform_indices = @transform_3, window_bounds = array<i64: 16, 128>}]} {
    %c0 = arith.constant 0 : index
    %c0_0 = arith.constant 0 : index
    %0 = vector.load %arg1[%c0, %c0_0] : memref<16x128xf32, #tpu.memory_space<vmem>>, vector<16x128xf32>
    %cst = arith.constant dense<0.000000e+00> : vector<16xf32>
    %1 = vector.multi_reduction <add>, %0, %cst [1] : vector<16x128xf32> to vector<16xf32>
    %2 = vector.shape_cast %1 : vector<16xf32> to vector<16x1xf32>
    %cst_1 = arith.constant 1.280000e+02 : f32
    %3 = vector.broadcast %cst_1 : f32 to vector<16x1xf32>
    %4 = arith.divf %2, %3 : vector<16x1xf32>
    %5 = vector.broadcast %4 : vector<16x1xf32> to vector<16x128xf32>
    %6 = arith.subf %0, %5 : vector<16x128xf32>
    %7 = arith.mulf %6, %6 : vector<16x128xf32>
    %cst_2 = arith.constant dense<0.000000e+00> : vector<16xf32>
    %8 = vector.multi_reduction <add>, %7, %cst_2 [1] : vector<16x128xf32> to vector<16xf32>
    %9 = vector.shape_cast %8 : vector<16xf32> to vector<16x1xf32>
    %cst_3 = arith.constant 0.00787401571 : f32
    %10 = vector.broadcast %cst_3 : f32 to vector<16x1xf32>
    %11 = arith.mulf %9, %10 : vector<16x1xf32>
    %12 = math.sqrt %11 : vector<16x1xf32>
    %cst_4 = arith.constant 9.99999997E-7 : f32
    %13 = vector.broadcast %cst_4 : f32 to vector<16x1xf32>
    %14 = arith.addf %12, %13 : vector<16x1xf32>
    %cst_5 = arith.constant 1.000000e+00 : f32
    %15 = vector.broadcast %cst_5 : f32 to vector<16x1xf32>
    %16 = arith.divf %15, %14 : vector<16x1xf32>
    %17 = vector.broadcast %16 : vector<16x1xf32> to vector<16x128xf32>
    %18 = arith.mulf %6, %17 : vector<16x128xf32>
    %c0_6 = arith.constant 0 : index
    %c0_7 = arith.constant 0 : index
    %19 = vector.load %arg2[%c0_6, %c0_7] : memref<1x128xf32, #tpu.memory_space<vmem>>, vector<1x128xf32>
    %20 = vector.broadcast %19 : vector<1x128xf32> to vector<16x128xf32>
    %21 = arith.mulf %20, %18 : vector<16x128xf32>
    %c0_8 = arith.constant 0 : index
    %c0_9 = arith.constant 0 : index
    %22 = vector.load %arg3[%c0_8, %c0_9] : memref<1x128xf32, #tpu.memory_space<vmem>>, vector<1x128xf32>
    %23 = vector.broadcast %22 : vector<1x128xf32> to vector<16x128xf32>
    %24 = arith.addf %21, %23 : vector<16x128xf32>
    %c0_10 = arith.constant 0 : index
    %c0_11 = arith.constant 0 : index
    %25 = vector.load %arg4[%c0_10, %c0_11] : memref<16x128xf32, #tpu.memory_space<vmem>>, vector<16x128xf32>
    tpu.vector_store %arg4[%c0_10, %c0_11], %24 {strides = array<i32>} : memref<16x128xf32, #tpu.memory_space<vmem>>, vector<16x128xf32>,
    return
  }
  func.func @transform_0(%arg0: i32) -> (i32, i32) {
    %c0_i32 = arith.constant 0 : i32
    %c0_i32_0 = arith.constant 0 : i32
    return %arg0, %c0_i32 : i32, i32
  }
  func.func @transform_1(%arg0: i32) -> (i32, i32) {
    %c0_i32 = arith.constant 0 : i32
    %c0_i32_0 = arith.constant 0 : i32
    %c0_i32_1 = arith.constant 0 : i32
    return %c0_i32, %c0_i32_0 : i32, i32
  }
  func.func @transform_2(%arg0: i32) -> (i32, i32) {
    %c0_i32 = arith.constant 0 : i32
    %c0_i32_0 = arith.constant 0 : i32
    %c0_i32_1 = arith.constant 0 : i32
    return %c0_i32, %c0_i32_0 : i32, i32
  }
  func.func @transform_3(%arg0: i32) -> (i32, i32) {
    %c0_i32 = arith.constant 0 : i32
    %c0_i32_0 = arith.constant 0 : i32
    return %arg0, %c0_i32 : i32, i32
  }
}

</mosaic_0001>

<bundles_post_ra>
// kernel: tpu_custom_call.1
= control target key start
LH: loop header
LB: loop body
LE: loop exit
PB: predicated region body
PF: predicated region fallthrough
CT: control target
= control target key end

     0   :  { %8 = vsyncpa [#allocation3], 0  ;;  %s711_s0 = inlined_call_operand.hbm [shape: f32[32,128], index: 0, kind: input, shape index: {}]   ;;  %s712_s1 = inlined_call_operand.vmem [shape: f32[1,128], index: 1, kind: input, shape index: {}]   ;;  %s713_s2 = inlined_call_operand.vmem [shape: f32[1,128], index: 2, kind: input, shape index: {}]   ;;  %s714_s3 = inlined_call_operand.hbm [shape: f32[32,128], index: 3, kind: output, shape index: {}]  }
   0x1   :  { %10 = vsyncpa [#allocation3 + $0x1], 0 }
   0x2   :  { %11 = vsyncpa [#allocation4], 0 }
   0x3   :  { %13 = vsyncpa [#allocation4 + $0x1], 0  ;;  %s539_s12 = smov 0   ;;  %s541_s13 = smov 0  }
   0x4   :  { %s543_s14 = smov 0   ;;  %s545_s15 = smov 0  }
   0x5 LB: > { %s560_s16 = sadd.s32 4294967295, %s511_s15   ;;  %s339_s17 = sadd.s32 4294967294, %s511_s15   ;;  %s511_s15 = sphi %s545_s15, %s727_s15   ;;  %s507_s14 = sphi %s543_s14, %s726_s14   ;;  %s503_s13 = sphi %s541_s13, %s725_s13   ;;  %s499_s12 = sphi %s539_s12, %s724_s12  }
   0x6   : > { %s564_s18 = sadd.s32 1, %s511_s15   ;;  %s26_s19 = sadd.s32 1, %s507_s14 }
   0x7   : > { %s23_s20 = ssub.s32 %s511_s15, %s564_s18  ;;  %p33_p0 = scmp.ne.s32.totalorder %s507_s14, %s503_s13 }
   0x8   : > { %p24_p1 = scmp.eq.s32.totalorder %s23_s20, 0  ;;  %p34_p2 = scmp.eq.s32.totalorder %s511_s15, 0 }
   0x9   : > { %p39_p3 = scmp.ne.s32.totalorder %s503_s13, %s499_s12  ;;  %p40_p4 = scmp.eq.s32.totalorder %s560_s16, 0 }
   0xa   : > { %s576_s21 = scalar_select %p24_p1, %s507_s14, %s26_s19  }
   0xb   : > { %p578_p5 = por %p34_p2, %p33_p0  ;;  %p582_p6 = por %p40_p4, %p39_p3 }
   0xc   : > { %p105_p7 = scmp.eq.s32.totalorder %s560_s16, 1  ;;  %p111_p8 = scmp.eq.s32.totalorder %s339_s17, 1 }
   0xd   : > { %p369_p10 = scmp.lt.s32.totalorder %s511_s15, 2  ;;  %s137_s26 = sand.u32 1, %s507_s14  }
   0xe   : > { %p589_p11 = por %p105_p7, %p33_p0  ;;  %p593_p12 = por %p111_p8, %p39_p3 }
   0xf   : > { %s355_s27 = sshll.u32 %s511_s15, 8  ;;  %s342_s28 = sshll.u32 %s137_s26, 4 }
  0x10   : > { %s718_s24 = scalar_select %p589_p11, 1, 0 }
  0x11   : > { %s719_s25 = scalar_select %p593_p12, 1, 0 }
  0x12   : > { %s602_s4 = scalar_lea.hbm %s711_s0, %s355_s27  ;;  %s141_s5 = scalar_lea.vmem [#allocation2], %s342_s28 }
  0x13   : > { %s148_s6 = sshll.u32 %s141_s5, 4  ;;  %p606_p13 = pnand %p369_p10, %p578_p5  ;;  %s610_s6 = int_to_ptr.vmem [resolvable:$true] %s148_s6 }
  0x14   : > { %s612_s8 = scalar_lea.sflag [#allocation3], %s137_s26  ;;  %s415_s9 = scalar_lea.hbm %s602_s4, 256 }
  0x15   : > { %p416_p0 = scmp.ne.s32.totalorder %s602_s4, %s415_s9  ;;  %p417_p1 = pneg %p606_p13 }
  0x16   : > { %s420_s17 = scalar_lea.hbm %s711_s0, 512  ;;  %p421_p4 = scmp.lt.u32.totalorder %s602_s4, %s711_s0 }
  0x17   : > { %p418_p2 = pnand %p417_p1, %p416_p0  ;;  %p422_p5 = scmp.lt.u32.totalorder %s420_s17, %s415_s9 }
  0x18   : > { %p424_p8 = scmp.lt.u32.totalorder %s415_s9, %s602_s4 }
  0x19   : > { %p419_p3 = pneg %p418_p2  ;;  %p423_p7 = por %p422_p5, %p421_p4 }
  0x1b   : > { %p425_p10 = por %p424_p8, %p423_p7 }
  0x1d   : > { %p426_p9 = pnand %p425_p10, %p419_p3 }
  0x1f   : > { %429 = shalt.err (!%p426_p9)
}
  0x20   : > { %s430_s22 = scalar_lea.vmem %s610_s6, 256  ;;  %s513_s26 = smov [#allocation2]  }
  0x21   : > { %p431_p0 = scmp.ne.s32.totalorder %s610_s6, %s430_s22  ;;  %s435_s27 = sshll.u32 %s513_s26, 4  ;;  %s436_s27 = int_to_ptr.vmem [resolvable:$false] %s435_s27 }
  0x22   : > { %s437_s28 = scalar_lea.vmem %s436_s27, 512  ;;  %p438_p11 = scmp.lt.s32.totalorder %s610_s6, %s436_s27 }
  0x23   : > { %p433_p2 = pnand %p431_p0, %p417_p1  ;;  %p439_p4 = scmp.lt.s32.totalorder %s437_s28, %s430_s22 }
  0x25   : > { %p434_p12 = pneg %p433_p2  ;;  %p440_p5 = por %p439_p4, %p438_p11 }
  0x27   : > { %p441_p7 = pnand %p440_p5, %p434_p12 }
  0x29   : > { %444 = shalt.err (!%p441_p7)
}
  0x2a   : > { %s514_s29 = smov 128   ;;  %s515_s30 = smov 8  }
  0x2b   : > { %364 = dma.hbm_to_vmem [thread:$0]  (!%p606_p13), %s602_s4, 256, %s610_s6, %s612_s8, %s514_s29, %s514_s29, %s515_s30  }
  0x2c   : > { %p345_p9 = scmp.ge.s32.totalorder %s511_s15, 1  ;;  %p156_p1 = scmp.lt.s32.totalorder %s511_s15, 3 }
  0x2e   : > { %p157_p3 = pnand %p345_p9, %p156_p1 }
  0x2f   : > { %s643_s5 = sand.u32 (!%p157_p3), 1, %s503_s13  }
  0x30   : > { %160 = sbr.rel (%p157_p3) target bundleno = 402 (0x192), region = 32  ;;  %s346_s9 = sshll.u32 (!%p157_p3), %s643_s5, 4 }
  0x31   : > { %s163_s10 = scalar_lea.sflag (!%p157_p3), [#allocation3], %s643_s5  ;;  %s166_s11 = scalar_lea.vmem (!%p157_p3), [#allocation2], %s346_s9 }
  0x37   : > { %490 = dma.done.wait (%p582_p6), %s163_s10, 256  }
  0x38   : > { %492 = vsyncadd (%p582_p6), %s163_s10, 4294967040  ;;  %v191_v0 = vld [vmem:[%s166_s11] sm:$0xff]  ;;  %v192_v1 = vld [vmem:[%s166_s11 + $0x8] sm:$0xff]  ;;  %s356_s8 = sshll.u32 %s560_s16, 8  ;;  %s188_s17 = scalar_lea.vmem [#allocation5], %s346_s9 }
  0x39   : > { %193 = vadd.xlane.f32.xlu0 %v191_v0  ;;  %v348_v27 = vld [vmem:[%s712_s1] ss:$0 sm:$0xff]  ;;  %s266_s19 = sshll.u32 %s188_s17, 4  ;;  %s665_s26 = scalar_lea.hbm %s714_s3, %s356_s8  ;;  %s667_s19 = int_to_ptr.vmem [resolvable:$true] %s266_s19 }
  0x3a   : > { %v349_v29 = vld [vmem:[%s713_s2] ss:$0 sm:$0xff]  ;;  %s253_s27 = scalar_lea.sflag [#allocation4], %s643_s5  ;;  %s445_s28 = scalar_lea.vmem %s667_s19, 256 }
  0x3b   : > { %p446_p6 = scmp.ne.s32.totalorder %s667_s19, %s445_s28  ;;  %p721_p11 = scmp.ne.s32.totalorder %s718_s24, 0 }
  0x3c   : > { %s516_s16 = smov [#allocation5]  }
  0x3d   : > { %195 = vadd.xlane.f32.xlu0 %v192_v1  ;;  %p447_p12 = pnand %p446_p6, %p721_p11  ;;  %s449_s29 = sshll.u32 %s516_s16, 4  ;;  %s450_s29 = int_to_ptr.vmem [resolvable:$false] %s449_s29 }
  0x3e   : > { %s451_s30 = scalar_lea.vmem %s450_s29, 512  ;;  %p452_p8 = scmp.lt.s32.totalorder %s667_s19, %s450_s29 }
  0x3f   : > { %p448_p13 = pneg %p447_p12  ;;  %p453_p10 = scmp.lt.s32.totalorder %s451_s30, %s445_s28 }
  0x41   : > { %p454_p0 = por %p453_p10, %p452_p8 }
  0x43   : > { %p455_p2 = pnand %p454_p0, %p448_p13 }
  0xc6   : > { %v194_v2 = vpop.xlane.xlu0 %193 }
  0xc7   : > { %v198_v3 = vmul.f32 0.0078125, %v194_v2 }
  0xc9   : > { %v200_v4 = vsub.f32 %v191_v0, %v198_v3 }
  0xca   : > { %v196_v5 = vpop.xlane.xlu0 %195 }
  0xcb   : > { %v199_v6 = vmul.f32 0.0078125, %v196_v5  ;;  %v202_v7 = vmul.f32 %v200_v4, %v200_v4 }
  0xcd   : > { %v201_v8 = vsub.f32 %v192_v1, %v199_v6  ;;  %204 = vadd.xlane.f32.xlu1 %v202_v7 }
  0xcf   : > { %v203_v9 = vmul.f32 %v201_v8, %v201_v8 }
  0xd1   : > { %206 = vadd.xlane.f32.xlu1 %v203_v9 }
 0x15a   : > { %v205_v10 = vpop.xlane.xlu1 %204 }
 0x15b   : > { %v208_v11 = vmul.f32 0.007874016, %v205_v10 }
 0x15d   : > { %407 = vrsqrt.f32 %v208_v11  ;;  %vm212_vm0 = vcmp.eq.f32.partialorder %v208_v11, inf  ;;  %v215_v16 = vand.u32 2147483648, %v208_v11  ;;  %vm214_vm1 = vcmp.eq.f32.partialorder %v208_v11, 0.0 }
 0x15e   : > { %v207_v12 = vpop.xlane.xlu1 %206 }
 0x15f   : > { %v209_v13 = vmul.f32 0.007874016, %v207_v12 }
 0x161   : > { %409 = vrsqrt.f32 %v209_v13  ;;  %vm219_vm2 = vcmp.eq.f32.partialorder %v209_v13, inf  ;;  %v222_v22 = vand.u32 2147483648, %v209_v13  ;;  %vm221_vm3 = vcmp.eq.f32.partialorder %v209_v13, 0.0 }
 0x167   : > { %v408_v14 = vpop.eup %407 }
 0x168   : > { %v211_v15 = vmul.f32 %v408_v14, %v208_v11 }
 0x16a   : > { %v213_v17 = vsel %vm212_vm0, %v208_v11, %v211_v15 }
 0x16b   : > { %v410_v18 = vpop.eup %409  ;;  %v216_v19 = vsel %vm214_vm1, %v215_v16, %v213_v17 }
 0x16c   : > { %v224_v20 = vadd.f32 1e-06, %v216_v19  ;;  %v218_v21 = vmul.f32 %v410_v18, %v209_v13 }
 0x16e   : > { %411 = vrcp.f32 %v224_v20  ;;  %v220_v23 = vsel %vm219_vm2, %v209_v13, %v218_v21 }
 0x16f   : > { %v223_v24 = vsel %vm221_vm3, %v222_v22, %v220_v23 }
 0x170   : > { %v225_v25 = vadd.f32 1e-06, %v223_v24 }
 0x172   : > { %413 = vrcp.f32 %v225_v25 }
 0x178   : > { %v412_v26 = vpop.eup %411 }
 0x179   : > { %v230_v28 = vmul.f32 %v412_v26, %v200_v4 }
 0x17b   : > { %v239_v30 = vmul.f32 %v348_v27, %v230_v28 }
 0x17c   : > { %v414_v31 = vpop.eup %413 }
 0x17d   : > { %v231_v32 = vmul.f32 %v414_v31, %v201_v8  ;;  %v248_v33 = vadd.f32 %v349_v29, %v239_v30 }
 0x17f   : > { %v240_v34 = vmul.f32 %v348_v27, %v231_v32  ;;  %250 = vst [vmem:[%s188_s17] sm:$0xff] %v248_v33 }
 0x181   : > { %v249_v35 = vadd.f32 %v349_v29, %v240_v34 }
 0x183   : > { %251 = vst [vmem:[%s188_s17 + $0x8] sm:$0xff] %v249_v35 }
 0x184   : > { %458 = shalt.err (!%p455_p2)
}
 0x185   : > { %s459_s9 = scalar_lea.hbm %s665_s26, 256  ;;  %s463_s23 = scalar_lea.hbm %s714_s3, 512 }
 0x186   : > { %p460_p4 = scmp.ne.s32.totalorder %s665_s26, %s459_s9  ;;  %p464_p9 = scmp.lt.u32.totalorder %s665_s26, %s714_s3 }
 0x187   : > { %p465_p1 = scmp.lt.u32.totalorder %s463_s23, %s459_s9  ;;  %p467_p6 = scmp.lt.u32.totalorder %s459_s9, %s665_s26 }
 0x188   : > { %p461_p5 = pnand %p460_p4, %p721_p11 }
 0x189   : > { %p466_p3 = por %p465_p1, %p464_p9 }
 0x18a   : > { %p462_p7 = pneg %p461_p5 }
 0x18b   : > { %p468_p12 = por %p467_p6, %p466_p3 }
 0x18d   : > { %p469_p13 = pnand %p468_p12, %p462_p7 }
 0x18f   : > { %472 = shalt.err (!%p469_p13)
}
 0x190   : > { %s517_s7 = smov 128   ;;  %s518_s8 = smov 8  }
 0x191   : > { %359 = dma.vmem_to_hbm [thread:$0]  (%p721_p11), %s667_s19, 256, %s665_s26, %s253_s27, %s517_s7, %s517_s7, %s518_s8  }
 0x192 PF: > { %s281_s17 = sand.u32 1, %s499_s12   ;;  %p722_p8 = scmp.ne.s32.totalorder %s719_s25, 0 }
 0x193   : > { %p723_p10 = scmp.ge.s32.totalorder %s511_s15, 2  ;;  %s282_s20 = scalar_lea.sflag [#allocation4], %s281_s17 }
 0x195   : > { %p366_p0 = pnand %p723_p10, %p722_p8 }
 0x197   : > { %494 = dma.done.wait (!%p366_p0), %s282_s20, 256  }
 0x198   : > { %496 = vsyncadd (!%p366_p0), %s282_s20, 4294967040  ;;  %p16_p2 = scmp.ge.s32.totalorder %s564_s18, 4   ;;  %s724_s12 = smov %s503_s13 }
 0x199   : > { %s725_s13 = smov %s507_s14  ;;  %s726_s14 = smov %s576_s21 }
 0x19a   : > { %s727_s15 = smov %s564_s18  ;;  %18 = sbr.rel (!%p16_p2) target bundleno = 5 (0x5), region = 77 }
 0x1a1   :  { %287 = vsyncpa [#allocation3], 1 }
 0x1a2   :  { %289 = vsyncpa [#allocation3 + $0x1], 1 }
 0x1a3   :  { %290 = vsyncpa [#allocation4], 1 }
 0x1a4   :  { %292 = vsyncpa [#allocation4 + $0x1], 1 }

</bundles_post_ra>
